<compile_context>
chip_gen: v7x
topology: tpu7x:2x2x1
jax: 0.10.0
libtpu: 0.0.40
codegen_flags: <defaults>
</compile_context>

<pallas_src>
import numpy as np
import jax
import jax.numpy as jnp
from jax.experimental import pallas as pl
from jax.experimental.pallas import tpu as pltpu

IGNORE_LABEL = -1

LOSS_PPL_A_WEIGHT = 0.01
LOSS_PPL_B_WEIGHT = 0.001
LOSS_BPC_WEIGHT = 0.01
LOSS_BPD_WEIGHT = 0.001


def _round_up(x, m):
    return ((x + m - 1) // m) * m


def _vmem_limit_bytes():
    # ~75% of physical VMEM (96 MiB on v5e/v6e, 48 MiB on v7x); safe fallback.
    try:
        cap = pltpu.get_tpu_info().vmem_capacity_bytes
        return int(min(cap * 3 // 4, 112 << 20))
    except Exception:
        return 48 << 20


# ---------------------------------------------------------------------------
# Kernel 1: bilinear upsample (fused MXU matmuls, bf16 in / f32 acc) +
#           two-pass softmax CE-with-ignore over the class axis.
# ---------------------------------------------------------------------------
def _seg_ce_kernel(segt_ref, wh_ref, wwt_ref, tgt_ref, out_ref):
    # segt_ref : (1, hs, C*ws)  bf16   seg for one batch element, classes packed on lanes
    # wh_ref   : (tile_h, hs)   bf16   row-interp rows for this H tile (align_corners=True)
    # wwt_ref  : (ws, W)        bf16   col-interp matrix transposed
    # tgt_ref  : (1, tile_h, W) int32
    # out_ref  : (1, 1, 2, W)   f32    per-program partials: [sum_rows(ce), sum_rows(valid)]
    ws = wwt_ref.shape[0]
    num_classes = segt_ref.shape[2] // ws

    wwt = wwt_ref[...]
    tgt = tgt_ref[0]                                  # (tile_h, W) int32

    # Row interpolation for ALL classes in one fused MXU matmul:
    #   (tile_h, hs) @ (hs, C*ws) -> (tile_h, C*ws), f32 accumulate.
    rowi = jnp.dot(wh_ref[...], segt_ref[0], preferred_element_type=jnp.float32)
    rowi_b = rowi.astype(jnp.bfloat16)                # single cast, reused by both passes

    def class_plane(c):
        # Column interpolation for class c: (tile_h, ws) @ (ws, W) -> (tile_h, W) f32.
        return jnp.dot(rowi_b[:, c * ws:(c + 1) * ws], wwt,
                       preferred_element_type=jnp.float32)

    # Pass 1: running max over classes (VALU only; recomputed matmuls ride the
    # otherwise-idle MXU slot).  No exps.
    m = class_plane(0)
    for c in range(1, num_classes):
        m = jnp.maximum(m, class_plane(c))

    # Pass 2: sum of exp(p - m) + gather of the target-class logit.  One exp per
    # class per plane (vs ~2 for an online softmax).
    s = jnp.zeros_like(m)
    g = jnp.zeros_like(m)
    for c in range(num_classes):
        p = class_plane(c)
        s = s + jnp.exp(p - m)
        g = g + jnp.where(tgt == c, p, 0.0)

    valid = tgt != IGNORE_LABEL
    ce = jnp.where(valid, (m + jnp.log(s)) - g, 0.0)

    # Direct row writes (no concatenate materialization).
    out_ref[:, :, 0:1, :] = jnp.sum(ce, axis=0, keepdims=True)[None, None]
    out_ref[:, :, 1:2, :] = jnp.sum(valid.astype(jnp.float32), axis=0,
                                    keepdims=True)[None, None]


def _choose_tile_h(n, h, c, hs, ws, w, max_tile_h, budget_bytes):
    """tile_h: multiple of 8, VMEM-budgeted, megacore-aware, low padding waste."""
    def working_set(th):
        # double-buffered inputs (bf16 seg/wh/wwt + int32 target)
        dbl_in = 2 * (hs * c * ws * 2 + th * hs * 2 + ws * w * 2 + th * w * 4)
        # live values: rowi (f32 + bf16 copy) + ~6 (tile_h, W) f32 planes
        live = th * c * ws * 6 + 6 * th * w * 4
        dbl_out = 2 * 2 * w * 4
        return dbl_in + live + dbl_out

    tile_h = min(_round_up(max_tile_h, 8), _round_up(h, 8))
    while tile_h > 8 and working_set(tile_h) > budget_bytes:
        tile_h -= 8
    # Keep >= 4 independent programs so both v7x TensorCores get work,
    # but never drop below a 128-row tile (MXU fill).
    while n * (-(-h // tile_h)) < 4 and tile_h > 128 and tile_h % 16 == 0:
        tile_h //= 2
    # Re-balance so padding waste is < 8 rows per tile.
    n_tiles = -(-h // tile_h)
    tile_h = min(tile_h, _round_up(-(-h // n_tiles), 8))
    return tile_h


def seg_ce_loss_parts(seg, target, max_tile_h=256):
    """Returns (sum of CE over valid pixels, valid pixel count)."""
    n, c, hs, ws = seg.shape
    h, w = target.shape[1], target.shape[2]

    vmem_limit = _vmem_limit_bytes()
    budget = min(40 << 20, max(vmem_limit - (8 << 20), 8 << 20))  # v7x-safe
    tile_h = _choose_tile_h(n, h, c, hs, ws, w, max_tile_h, budget)
    h_pad = _round_up(h, tile_h)
    n_tiles = h_pad // tile_h

    # Interpolation matrices (align_corners=True); padded rows are all-zero, so the
    # padded output rows are 0-logits with IGNORE_LABEL targets -> contribute nothing.
    wh_np = np.zeros((h_pad, hs), dtype=np.float32)
    wh_np[:h] = bilinear_matrix(h, hs)
    wh = jnp.asarray(wh_np, dtype=jnp.bfloat16)                  # (H_pad, hs)
    wwt = jnp.asarray(bilinear_matrix(w, ws).T, dtype=jnp.bfloat16)  # (ws, W)

    # Pack classes onto the lane axis once in the wrapper (layout plumbing only).
    seg_t = jnp.transpose(seg, (0, 2, 1, 3)).reshape(n, hs, c * ws)
    seg_t = seg_t.astype(jnp.bfloat16)

    tgt = target.astype(jnp.int32)
    if h_pad != h:
        tgt = jnp.pad(tgt, ((0, 0), (0, h_pad - h), (0, 0)),
                      constant_values=IGNORE_LABEL)

    partials = pl.pallas_call(
        _seg_ce_kernel,
        out_shape=jax.ShapeDtypeStruct((n, n_tiles, 2, w), jnp.float32),
        grid=(n, n_tiles),
        in_specs=[
            pl.BlockSpec((1, hs, c * ws), lambda i, j: (i, 0, 0)),
            pl.BlockSpec((tile_h, hs), lambda i, j: (j, 0)),
            pl.BlockSpec((ws, w), lambda i, j: (0, 0)),
            pl.BlockSpec((1, tile_h, w), lambda i, j: (i, j, 0)),
        ],
        out_specs=pl.BlockSpec((1, 1, 2, w), lambda i, j: (i, j, 0, 0)),
        compiler_params=pltpu.CompilerParams(
            dimension_semantics=("parallel", "parallel"),
            vmem_limit_bytes=vmem_limit),
    )(seg_t, wh, wwt, tgt)

    ce_sum = jnp.sum(partials[:, :, 0, :])
    cnt = jnp.sum(partials[:, :, 1, :])
    return ce_sum, cnt


# ---------------------------------------------------------------------------
# Kernel 2: lane-dense row-wise CE-with-ignore (PPL_a / BPC) + (1 - gathered)^2
#           (PPL_b / BPD).  Logits arrive transposed as (K, M).
# ---------------------------------------------------------------------------
def _rowwise_kernel(logits_ref, tgt_ref, out_ref):
    # logits_ref : (K, TM) f32   (class axis on sublanes, rows on lanes)
    # tgt_ref    : (1, TM) int32
    # out_ref    : (3, TM) f32   per-row [ce, sq, valid] partials
    logits = logits_ref[...]
    tgt = tgt_ref[...]                              # (1, TM)
    valid = tgt != IGNORE_LABEL

    m = jnp.max(logits, axis=0, keepdims=True)      # (1, TM)
    s = jnp.sum(jnp.exp(logits - m), axis=0, keepdims=True)
    lse = m + jnp.log(s)

    row = jax.lax.broadcasted_iota(jnp.int32, logits.shape, 0)
    g = jnp.sum(jnp.where(row == tgt, logits, 0.0), axis=0, keepdims=True)

    out_ref[0:1, :] = jnp.where(valid, lse - g, 0.0)
    out_ref[1:2, :] = jnp.where(valid, (1.0 - g) ** 2, 0.0)
    out_ref[2:3, :] = valid.astype(jnp.float32)


def rowwise_loss_parts(logits, target, tm=4096):
    """Returns (ce_sum, sq_sum, valid_count) over all rows with target != ignore."""
    m, k = logits.shape
    tm = max(128, min(tm, _round_up(m, 128)))       # big tiles; cap padding waste
    m_pad = _round_up(m, tm)

    # TODO(synk): have the producer emit logits already lane-dense as (K, M); the
    # transpose below is one extra HBM pass for an otherwise HBM-bound kernel.
    logits_t = jnp.transpose(logits)                # (K, M) lane-dense
    tgt = target.astype(jnp.int32)
    if m_pad != m:
        logits_t = jnp.pad(logits_t, ((0, 0), (0, m_pad - m)))
        tgt = jnp.pad(tgt, (0, m_pad - m), constant_values=IGNORE_LABEL)
    tgt2 = tgt.reshape(1, m_pad)
    n_tiles = m_pad // tm

    parts = pl.pallas_call(
        _rowwise_kernel,
        out_shape=jax.ShapeDtypeStruct((3, m_pad), jnp.float32),
        grid=(n_tiles,),
        in_specs=[
            pl.BlockSpec((k, tm), lambda i: (0, i)),
            pl.BlockSpec((1, tm), lambda i: (0, i)),
        ],
        out_specs=pl.BlockSpec((3, tm), lambda i: (0, i)),
        compiler_params=pltpu.CompilerParams(
            dimension_semantics=("parallel",),
            vmem_limit_bytes=_vmem_limit_bytes()),
    )(logits_t, tgt2)

    sums = jnp.sum(parts, axis=1)
    return sums[0], sums[1], sums[2]


# ---------------------------------------------------------------------------
# Glue: interpolation matrices (align_corners=True) + full loss composition
# ---------------------------------------------------------------------------
def bilinear_matrix(out_size, in_size):
    """PyTorch F.interpolate(mode='bilinear', align_corners=True) as a matrix."""
    w = np.zeros((out_size, in_size), dtype=np.float32)
    if out_size == 1:
        w[0, 0] = 1.0
        return w
    scale = (in_size - 1) / (out_size - 1)
    for i in range(out_size):
        src = i * scale
        i0 = min(int(np.floor(src)), in_size - 1)
        i1 = min(i0 + 1, in_size - 1)
        frac = src - i0
        w[i, i0] += 1.0 - frac
        w[i, i1] += frac
    return w


def pixel_prototype_ce_loss(preds, target):
    """Forward of PixelPrototypeCELoss_Ultra_Final_1 (dict branch)."""
    seg = preds["seg"]                          # (N, C, hs, ws)
    contrast_logits = preds["logits"]           # (M, K)
    contrast_target = preds["target"]           # (M,)
    boundary_logits = preds["boundary_logits"]  # (Mb, Kb)
    boundary_target = preds["boundary_target"]  # (Mb,)

    seg_sum, seg_cnt = seg_ce_loss_parts(seg, target)
    c_ce, c_sq, c_cnt = rowwise_loss_parts(contrast_logits, contrast_target)
    b_ce, b_sq, b_cnt = rowwise_loss_parts(boundary_logits, boundary_target)

    loss_seg = seg_sum / seg_cnt
    loss_ppc = c_ce / c_cnt
    loss_ppd = c_sq / c_cnt
    loss_bpc = b_ce / b_cnt
    loss_bpd = b_sq / b_cnt

    prototype_loss = LOSS_PPL_A_WEIGHT * loss_ppc + LOSS_PPL_B_WEIGHT * loss_ppd
    boundary_prototype_loss = LOSS_BPC_WEIGHT * loss_bpc + LOSS_BPD_WEIGHT * loss_bpd
    return loss_seg + prototype_loss + boundary_prototype_loss


# ---------------------------------------------------------------------------
# Pure-JAX f32 reference (same math, no Pallas) for a sanity check
# ---------------------------------------------------------------------------
def _ref_rowwise(logits, tgt):
    valid = tgt != IGNORE_LABEL
    ts = jnp.where(valid, tgt, 0)
    logp = jax.nn.log_softmax(logits, axis=1)
    g_logp = jnp.take_along_axis(logp, ts[:, None], axis=1)[:, 0]
    g_raw = jnp.take_along_axis(logits, ts[:, None], axis=1)[:, 0]
    cnt = jnp.sum(valid.astype(jnp.float32))
    ce = jnp.sum(jnp.where(valid, -g_logp, 0.0)) / cnt
    sq = jnp.sum(jnp.where(valid, (1.0 - g_raw) ** 2, 0.0)) / cnt
    return ce, sq


def reference_loss(preds, target):
    seg = preds["seg"]
    n, c, hs, ws = seg.shape
    h, w = target.shape[1], target.shape[2]
    wh = jnp.asarray(bilinear_matrix(h, hs))
    ww = jnp.asarray(bilinear_matrix(w, ws))
    pred = jnp.einsum("hp,ncpq,wq->nchw", wh, seg, ww)
    logp = jax.nn.log_softmax(pred, axis=1)
    valid = target != IGNORE_LABEL
    ts = jnp.where(valid, target, 0)
    g = jnp.take_along_axis(logp, ts[:, None], axis=1)[:, 0]
    loss_seg = jnp.sum(jnp.where(valid, -g, 0.0)) / jnp.sum(valid.astype(jnp.float32))
    ppc, ppd = _ref_rowwise(preds["logits"], preds["target"])
    bpc, bpd = _ref_rowwise(preds["boundary_logits"], preds["boundary_target"])
    return (loss_seg
            + LOSS_PPL_A_WEIGHT * ppc + LOSS_PPL_B_WEIGHT * ppd
            + LOSS_BPC_WEIGHT * bpc + LOSS_BPD_WEIGHT * bpd)


if __name__ == "__main__":
    key = jax.random.PRNGKey(0)
    k1, k2, k3, k4, k5, k6, k7 = jax.random.split(key, 7)

    N, C, HS, WS = 2, 4, 8, 8       # seg feature map
    H, W = 32, 32                   # target resolution
    M, K = 300, 8                   # contrast logits (non-multiple of 128 -> padding path)
    MB, KB = 200, 2                 # boundary logits

    seg = jax.random.normal(k1, (N, C, HS, WS), dtype=jnp.float32)
    target = jax.random.randint(k2, (N, H, W), 0, C, dtype=jnp.int32)
    target = jnp.where(jax.random.uniform(k3, (N, H, W)) < 0.1, IGNORE_LABEL, target)

    contrast_logits = jax.random.normal(k4, (M, K), dtype=jnp.float32)
    contrast_target = jax.random.randint(k5, (M,), 0, K, dtype=jnp.int32)
    contrast_target = jnp.where(jax.random.uniform(k6, (M,)) < 0.1, IGNORE_LABEL,
                                contrast_target)

    boundary_logits = jax.random.normal(k7, (MB, KB), dtype=jnp.float32)
    boundary_target = jax.random.randint(jax.random.fold_in(key, 11), (MB,), 0, KB,
                                         dtype=jnp.int32)
    boundary_target = jnp.where(
        jax.random.uniform(jax.random.fold_in(key, 12), (MB,)) < 0.1,
        IGNORE_LABEL, boundary_target)

    preds = {
        "seg": seg,
        "logits": contrast_logits,
        "target": contrast_target,
        "boundary_logits": boundary_logits,
        "boundary_target": boundary_target,
    }

    out = pixel_prototype_ce_loss(preds, target)
    out = jax.block_until_ready(out)

    ref = jax.block_until_ready(reference_loss(preds, target))
    # bf16 MXU inputs (f32 accumulate) vs. the pure-f32 reference: loose tolerance.
    np.testing.assert_allclose(np.asarray(out), np.asarray(ref), rtol=2e-2, atol=2e-2)

    print("KERNEL_OK")
</pallas_src>

<mosaic_0001>
module attributes {stable_mosaic.version = 11 : i64} {
  func.func @_seg_ce_kernel(%arg0: i32, %arg1: i32, %arg2: memref<1x8x32xbf16, #tpu.memory_space<vmem>>, %arg3: memref<32x8xbf16, #tpu.memory_space<vmem>>, %arg4: memref<8x32xbf16, #tpu.memory_space<vmem>>, %arg5: memref<1x32x32xi32, #tpu.memory_space<vmem>>, %arg6: memref<1x1x2x32xf32, #tpu.memory_space<vmem>>) attributes {dimension_semantics = [#tpu.dimension_semantics<parallel>, #tpu.dimension_semantics<parallel>], iteration_bounds = array<i64: 2, 1>, scalar_prefetch = 0 : i64, scratch_operands = 0 : i64, tpu.core_type = #tpu.core_type<tc>, window_params = [{transform_indices = @transform_0, window_bounds = array<i64: 1, 8, 32>}, {transform_indices = @transform_1, window_bounds = array<i64: 32, 8>}, {pipeline_mode = #tpu.pipeline_mode<synchronous>, transform_indices = @transform_2, window_bounds = array<i64: 8, 32>}, {transform_indices = @transform_3, window_bounds = array<i64: 1, 32, 32>}, {transform_indices = @transform_4, window_bounds = array<i64: 1, 1, 2, 32>}]} {
    %c0 = arith.constant 0 : index
    %c0_0 = arith.constant 0 : index
    %0 = vector.load %arg4[%c0, %c0_0] : memref<8x32xbf16, #tpu.memory_space<vmem>>, vector<8x32xbf16>
    %c0_1 = arith.constant 0 : index
    %c0_2 = arith.constant 0 : index
    %c0_3 = arith.constant 0 : index
    %1 = vector.load %arg5[%c0_1, %c0_2, %c0_3] : memref<1x32x32xi32, #tpu.memory_space<vmem>>, vector<1x32x32xi32>
    %2 = vector.shape_cast %1 : vector<1x32x32xi32> to vector<32x32xi32>
    %c0_4 = arith.constant 0 : index
    %c0_5 = arith.constant 0 : index
    %3 = vector.load %arg3[%c0_4, %c0_5] : memref<32x8xbf16, #tpu.memory_space<vmem>>, vector<32x8xbf16>
    %c0_6 = arith.constant 0 : index
    %c0_7 = arith.constant 0 : index
    %c0_8 = arith.constant 0 : index
    %4 = vector.load %arg2[%c0_6, %c0_7, %c0_8] : memref<1x8x32xbf16, #tpu.memory_space<vmem>>, vector<1x8x32xbf16>
    %5 = vector.shape_cast %4 : vector<1x8x32xbf16> to vector<8x32xbf16>
    %cst = arith.constant dense<0.000000e+00> : vector<32x32xf32>
    %6 = tpu.matmul %3, %5, %cst {dimension_numbers = #tpu.dot_dimension_numbers<[1], [0], [0], [1], [0, 0, 1, 1], [], []>} : vector<32x8xbf16>, vector<8x32xbf16>, vector<32x32xf32> -> vector<32x32xf32>
    %7 = arith.truncf %6 : vector<32x32xf32> to vector<32x32xbf16>
    %8 = vector.extract_strided_slice %7 {offsets = [0, 0], sizes = [32, 8], strides = [1, 1]} : vector<32x32xbf16> to vector<32x8xbf16>
    %cst_9 = arith.constant dense<0.000000e+00> : vector<32x32xf32>
    %9 = tpu.matmul %8, %0, %cst_9 {dimension_numbers = #tpu.dot_dimension_numbers<[1], [0], [0], [1], [0, 0, 1, 1], [], []>} : vector<32x8xbf16>, vector<8x32xbf16>, vector<32x32xf32> -> vector<32x32xf32>
    %10 = vector.extract_strided_slice %7 {offsets = [0, 8], sizes = [32, 8], strides = [1, 1]} : vector<32x32xbf16> to vector<32x8xbf16>
    %cst_10 = arith.constant dense<0.000000e+00> : vector<32x32xf32>
    %11 = tpu.matmul %10, %0, %cst_10 {dimension_numbers = #tpu.dot_dimension_numbers<[1], [0], [0], [1], [0, 0, 1, 1], [], []>} : vector<32x8xbf16>, vector<8x32xbf16>, vector<32x32xf32> -> vector<32x32xf32>
    %12 = arith.maximumf %9, %11 : vector<32x32xf32>
    %13 = vector.extract_strided_slice %7 {offsets = [0, 16], sizes = [32, 8], strides = [1, 1]} : vector<32x32xbf16> to vector<32x8xbf16>
    %cst_11 = arith.constant dense<0.000000e+00> : vector<32x32xf32>
    %14 = tpu.matmul %13, %0, %cst_11 {dimension_numbers = #tpu.dot_dimension_numbers<[1], [0], [0], [1], [0, 0, 1, 1], [], []>} : vector<32x8xbf16>, vector<8x32xbf16>, vector<32x32xf32> -> vector<32x32xf32>
    %15 = arith.maximumf %12, %14 : vector<32x32xf32>
    %16 = vector.extract_strided_slice %7 {offsets = [0, 24], sizes = [32, 8], strides = [1, 1]} : vector<32x32xbf16> to vector<32x8xbf16>
    %cst_12 = arith.constant dense<0.000000e+00> : vector<32x32xf32>
    %17 = tpu.matmul %16, %0, %cst_12 {dimension_numbers = #tpu.dot_dimension_numbers<[1], [0], [0], [1], [0, 0, 1, 1], [], []>} : vector<32x8xbf16>, vector<8x32xbf16>, vector<32x32xf32> -> vector<32x32xf32>
    %18 = arith.maximumf %15, %17 : vector<32x32xf32>
    %cst_13 = arith.constant 0.000000e+00 : f32
    %19 = vector.broadcast %cst_13 : f32 to vector<32x32xf32>
    %cst_14 = arith.constant 0.000000e+00 : f32
    %20 = vector.broadcast %cst_14 : f32 to vector<32x32xf32>
    %21 = vector.extract_strided_slice %7 {offsets = [0, 0], sizes = [32, 8], strides = [1, 1]} : vector<32x32xbf16> to vector<32x8xbf16>
    %cst_15 = arith.constant dense<0.000000e+00> : vector<32x32xf32>
    %22 = tpu.matmul %21, %0, %cst_15 {dimension_numbers = #tpu.dot_dimension_numbers<[1], [0], [0], [1], [0, 0, 1, 1], [], []>} : vector<32x8xbf16>, vector<8x32xbf16>, vector<32x32xf32> -> vector<32x32xf32>
    %23 = arith.subf %22, %18 : vector<32x32xf32>
    %24 = math.exp %23 : vector<32x32xf32>
    %25 = arith.addf %19, %24 : vector<32x32xf32>
    %c0_i32 = arith.constant 0 : i32
    %26 = vector.broadcast %c0_i32 : i32 to vector<32x32xi32>
    %27 = arith.cmpi eq, %2, %26 : vector<32x32xi32>
    %cst_16 = arith.constant 0.000000e+00 : f32
    %28 = vector.broadcast %cst_16 : f32 to vector<32x32xf32>
    %29 = arith.select %27, %22, %28 : vector<32x32xi1>, vector<32x32xf32>
    %30 = arith.addf %20, %29 : vector<32x32xf32>
    %31 = vector.extract_strided_slice %7 {offsets = [0, 8], sizes = [32, 8], strides = [1, 1]} : vector<32x32xbf16> to vector<32x8xbf16>
    %cst_17 = arith.constant dense<0.000000e+00> : vector<32x32xf32>
    %32 = tpu.matmul %31, %0, %cst_17 {dimension_numbers = #tpu.dot_dimension_numbers<[1], [0], [0], [1], [0, 0, 1, 1], [], []>} : vector<32x8xbf16>, vector<8x32xbf16>, vector<32x32xf32> -> vector<32x32xf32>
    %33 = arith.subf %32, %18 : vector<32x32xf32>
    %34 = math.exp %33 : vector<32x32xf32>
    %35 = arith.addf %25, %34 : vector<32x32xf32>
    %c1_i32 = arith.constant 1 : i32
    %36 = vector.broadcast %c1_i32 : i32 to vector<32x32xi32>
    %37 = arith.cmpi eq, %2, %36 : vector<32x32xi32>
    %cst_18 = arith.constant 0.000000e+00 : f32
    %38 = vector.broadcast %cst_18 : f32 to vector<32x32xf32>
    %39 = arith.select %37, %32, %38 : vector<32x32xi1>, vector<32x32xf32>
    %40 = arith.addf %30, %39 : vector<32x32xf32>
    %41 = vector.extract_strided_slice %7 {offsets = [0, 16], sizes = [32, 8], strides = [1, 1]} : vector<32x32xbf16> to vector<32x8xbf16>
    %cst_19 = arith.constant dense<0.000000e+00> : vector<32x32xf32>
    %42 = tpu.matmul %41, %0, %cst_19 {dimension_numbers = #tpu.dot_dimension_numbers<[1], [0], [0], [1], [0, 0, 1, 1], [], []>} : vector<32x8xbf16>, vector<8x32xbf16>, vector<32x32xf32> -> vector<32x32xf32>
    %43 = arith.subf %42, %18 : vector<32x32xf32>
    %44 = math.exp %43 : vector<32x32xf32>
    %45 = arith.addf %35, %44 : vector<32x32xf32>
    %c2_i32 = arith.constant 2 : i32
    %46 = vector.broadcast %c2_i32 : i32 to vector<32x32xi32>
    %47 = arith.cmpi eq, %2, %46 : vector<32x32xi32>
    %cst_20 = arith.constant 0.000000e+00 : f32
    %48 = vector.broadcast %cst_20 : f32 to vector<32x32xf32>
    %49 = arith.select %47, %42, %48 : vector<32x32xi1>, vector<32x32xf32>
    %50 = arith.addf %40, %49 : vector<32x32xf32>
    %51 = vector.extract_strided_slice %7 {offsets = [0, 24], sizes = [32, 8], strides = [1, 1]} : vector<32x32xbf16> to vector<32x8xbf16>
    %cst_21 = arith.constant dense<0.000000e+00> : vector<32x32xf32>
    %52 = tpu.matmul %51, %0, %cst_21 {dimension_numbers = #tpu.dot_dimension_numbers<[1], [0], [0], [1], [0, 0, 1, 1], [], []>} : vector<32x8xbf16>, vector<8x32xbf16>, vector<32x32xf32> -> vector<32x32xf32>
    %53 = arith.subf %52, %18 : vector<32x32xf32>
    %54 = math.exp %53 : vector<32x32xf32>
    %55 = arith.addf %45, %54 : vector<32x32xf32>
    %c3_i32 = arith.constant 3 : i32
    %56 = vector.broadcast %c3_i32 : i32 to vector<32x32xi32>
    %57 = arith.cmpi eq, %2, %56 : vector<32x32xi32>
    %cst_22 = arith.constant 0.000000e+00 : f32
    %58 = vector.broadcast %cst_22 : f32 to vector<32x32xf32>
    %59 = arith.select %57, %52, %58 : vector<32x32xi1>, vector<32x32xf32>
    %60 = arith.addf %50, %59 : vector<32x32xf32>
    %c-1_i32 = arith.constant -1 : i32
    %61 = vector.broadcast %c-1_i32 : i32 to vector<32x32xi32>
    %62 = arith.cmpi ne, %2, %61 : vector<32x32xi32>
    %63 = math.log %55 : vector<32x32xf32>
    %64 = arith.addf %18, %63 : vector<32x32xf32>
    %65 = arith.subf %64, %60 : vector<32x32xf32>
    %cst_23 = arith.constant 0.000000e+00 : f32
    %66 = vector.broadcast %cst_23 : f32 to vector<32x32xf32>
    %67 = arith.select %62, %65, %66 : vector<32x32xi1>, vector<32x32xf32>
    %cst_24 = arith.constant dense<0.000000e+00> : vector<32xf32>
    %68 = vector.multi_reduction <add>, %67, %cst_24 [0] : vector<32x32xf32> to vector<32xf32>
    %69 = vector.shape_cast %68 : vector<32xf32> to vector<1x32xf32>
    %70 = vector.shape_cast %69 : vector<1x32xf32> to vector<1x1x1x32xf32>
    %c0_25 = arith.constant 0 : index
    %c0_26 = arith.constant 0 : index
    %c0_27 = arith.constant 0 : index
    %c0_28 = arith.constant 0 : index
    %71 = vector.load %arg6[%c0_25, %c0_26, %c0_27, %c0_28] : memref<1x1x2x32xf32, #tpu.memory_space<vmem>>, vector<1x1x1x32xf32>
    tpu.vector_store %arg6[%c0_25, %c0_26, %c0_27, %c0_28], %70 {strides = array<i32>} : memref<1x1x2x32xf32, #tpu.memory_space<vmem>>, vector<1x1x1x32xf32>,
    %72 = arith.extui %62 : vector<32x32xi1> to vector<32x32xi32>
    %73 = arith.sitofp %72 : vector<32x32xi32> to vector<32x32xf32>
    %cst_29 = arith.constant dense<0.000000e+00> : vector<32xf32>
    %74 = vector.multi_reduction <add>, %73, %cst_29 [0] : vector<32x32xf32> to vector<32xf32>
    %75 = vector.shape_cast %74 : vector<32xf32> to vector<1x32xf32>
    %76 = vector.shape_cast %75 : vector<1x32xf32> to vector<1x1x1x32xf32>
    %c0_30 = arith.constant 0 : index
    %c0_31 = arith.constant 0 : index
    %c1 = arith.constant 1 : index
    %c0_32 = arith.constant 0 : index
    %77 = vector.load %arg6[%c0_30, %c0_31, %c1, %c0_32] : memref<1x1x2x32xf32, #tpu.memory_space<vmem>>, vector<1x1x1x32xf32>
    tpu.vector_store %arg6[%c0_30, %c0_31, %c1, %c0_32], %76 {strides = array<i32>} : memref<1x1x2x32xf32, #tpu.memory_space<vmem>>, vector<1x1x1x32xf32>,
    return
  }
  func.func @transform_0(%arg0: i32, %arg1: i32) -> (i32, i32, i32) {
    %c0_i32 = arith.constant 0 : i32
    %c0_i32_0 = arith.constant 0 : i32
    %c0_i32_1 = arith.constant 0 : i32
    return %arg0, %c0_i32, %c0_i32_0 : i32, i32, i32
  }
  func.func @transform_1(%arg0: i32, %arg1: i32) -> (i32, i32) {
    %c0_i32 = arith.constant 0 : i32
    %c0_i32_0 = arith.constant 0 : i32
    return %arg1, %c0_i32 : i32, i32
  }
  func.func @transform_2(%arg0: i32, %arg1: i32) -> (i32, i32) {
    %c0_i32 = arith.constant 0 : i32
    %c0_i32_0 = arith.constant 0 : i32
    %c0_i32_1 = arith.constant 0 : i32
    return %c0_i32, %c0_i32_0 : i32, i32
  }
  func.func @transform_3(%arg0: i32, %arg1: i32) -> (i32, i32, i32) {
    %c0_i32 = arith.constant 0 : i32
    %c0_i32_0 = arith.constant 0 : i32
    return %arg0, %arg1, %c0_i32 : i32, i32, i32
  }
  func.func @transform_4(%arg0: i32, %arg1: i32) -> (i32, i32, i32, i32) {
    %c0_i32 = arith.constant 0 : i32
    %c0_i32_0 = arith.constant 0 : i32
    %c0_i32_1 = arith.constant 0 : i32
    return %arg0, %arg1, %c0_i32, %c0_i32_0 : i32, i32, i32, i32
  }
}

</mosaic_0001>

<bundles_post_ra>
// kernel: tpu_custom_call.1
= control target key start
LH: loop header
LB: loop body
LE: loop exit
PB: predicated region body
PF: predicated region fallthrough
CT: control target
= control target key end

     0   :  { %9 = vsyncpa [#allocation3], 0  ;;  %s1610_s0 = inlined_call_operand.vmem [shape: bf16[2,8,32], index: 0, kind: input, shape index: {}]   ;;  %s1611_s1 = inlined_call_operand.vmem [shape: bf16[32,8], index: 1, kind: input, shape index: {}]   ;;  %s1612_s2 = inlined_call_operand.vmem [shape: bf16[8,32], index: 2, kind: input, shape index: {}]   ;;  %s1613_s3 = inlined_call_operand.hbm [shape: s32[2,32,32], index: 3, kind: input, shape index: {}]   ;;  %s1614_s4 = inlined_call_operand.hbm [shape: f32[2,1,2,32], index: 4, kind: output, shape index: {}]  }
   0x1   :  { %11 = vsyncpa [#allocation3 + $0x1], 0 }
   0x2   :  { %12 = vsyncpa [#allocation4], 0 }
   0x3   :  { %14 = vsyncpa [#allocation4 + $0x1], 0  ;;  %s1244_s15 = smov 0   ;;  %s1246_s16 = smov 0  }
   0x4   :  { %s1248_s17 = smov 0   ;;  %s1250_s18 = smov 0  }
   0x5   :  { %s1252_s19 = smov 0   ;;  %s1254_s20 = smov 0  }
   0x6 LB: > { %s904_s21 = sadd.s32 4294967295, %s1209_s20   ;;  %s905_s22 = sadd.s32 4294967294, %s1209_s20   ;;  %s1209_s20 = sphi %s1254_s20, %s20_s20   ;;  %s1205_s19 = sphi %s1252_s19, %s1633_s19   ;;  %s1201_s18 = sphi %s1250_s18, %s1632_s18   ;;  %s1197_s17 = sphi %s1248_s17, %s1631_s17   ;;  %s1193_s16 = sphi %s1246_s16, %s1630_s16   ;;  %s1189_s15 = sphi %s1244_s15, %s1629_s15  }
   0x7   : > { %s32_s23 = sadd.s32 1, %s1205_s19  ;;  %s114_s24 = sadd.s32 1, %s1197_s17 }
   0x8   : > { %p34_p0 = scmp.ge.s32.totalorder %s32_s23, 2  ;;  %p121_p1 = scmp.ne.s32.totalorder %s1197_s17, %s1193_s16 }
   0x9   : > { %p122_p2 = scmp.eq.s32.totalorder %s1209_s20, 0  ;;  %p127_p3 = scmp.ne.s32.totalorder %s1193_s16, %s1189_s15 }
   0xa   : > { %s1635_s23 = smov (%p34_p0, %s32_s23), 0  ;;  %p128_p5 = scmp.eq.s32.totalorder %s904_s21, 0 }
   0xb   : > { %p1285_p4 = por %p122_p2, %p121_p1  ;;  %s109_s26 = ssub.s32 %s1205_s19, %s1635_s23 }
   0xc   : > { %p153_p6 = scmp.eq.s32.totalorder %s904_s21, 1  ;;  %p112_p7 = scmp.eq.s32.totalorder %s109_s26, 0 }
   0xd   : > { %p1291_p8 = por %p128_p5, %p127_p3  ;;  %p159_p10 = scmp.eq.s32.totalorder %s905_s22, 1 }
   0xe   : > { %p1295_p9 = por %p153_p6, %p121_p1  ;;  %p999_p13 = scmp.lt.s32.totalorder %s1209_s20, 2 }
   0xf   : > { %s1300_s29 = scalar_select %p112_p7, %s1197_s17, %s114_s24  }
  0x10   : > { %s1620_s28 = scalar_select %p1295_p9, 1, 0 }
  0x11   : > { %p1302_p11 = por %p159_p10, %p127_p3  ;;  %s198_s5 = sand.u32 1, %s1197_s17  }
  0x12   : > { %s909_s6 = sshll.u32 %s198_s5, 5  ;;  %s936_s7 = sshll.u32 %s1205_s19, 9 }
  0x13   : > { %s1621_s30 = scalar_select %p1302_p11, 1, 0 }
  0x14   : > { %s1313_s10 = scalar_lea.hbm %s1613_s3, %s936_s7  ;;  %s202_s11 = scalar_lea.vmem [#allocation2], %s909_s6 }
  0x15   : > { %s211_s12 = sshll.u32 %s202_s11, 4  ;;  %p1319_p0 = pnand %p999_p13, %p1285_p4  ;;  %s1315_s12 = int_to_ptr.vmem [resolvable:$true] %s211_s12 }
  0x16   : > { %s1324_s14 = scalar_lea.sflag [#allocation3], %s198_s5  ;;  %s1097_s21 = scalar_lea.hbm %s1313_s10, 512 }
  0x17   : > { %p1098_p2 = scmp.ne.s32.totalorder %s1313_s10, %s1097_s21  ;;  %p1099_p3 = pneg %p1319_p0 }
  0x18   : > { %s1102_s25 = scalar_lea.hbm %s1613_s3, 1024  ;;  %p1103_p4 = scmp.lt.u32.totalorder %s1313_s10, %s1613_s3 }
  0x19   : > { %p1100_p5 = pnand %p1099_p3, %p1098_p2  ;;  %p1104_p7 = scmp.lt.u32.totalorder %s1102_s25, %s1097_s21 }
  0x1a   : > { %p1106_p13 = scmp.lt.u32.totalorder %s1097_s21, %s1313_s10 }
  0x1b   : > { %p1101_p6 = pneg %p1100_p5  ;;  %p1105_p10 = por %p1104_p7, %p1103_p4 }
  0x1d   : > { %p1107_p12 = por %p1106_p13, %p1105_p10 }
  0x1f   : > { %p1108_p1 = pnand %p1107_p12, %p1101_p6 }
  0x21   : > { %1111 = shalt.err (!%p1108_p1)
}
  0x22   : > { %s1112_s5 = scalar_lea.vmem %s1315_s12, 512  ;;  %s1211_s7 = smov [#allocation2]  }
  0x23   : > { %p1113_p2 = scmp.ne.s32.totalorder %s1315_s12, %s1112_s5  ;;  %s1117_s8 = sshll.u32 %s1211_s7, 4  ;;  %s1118_s8 = int_to_ptr.vmem [resolvable:$false] %s1117_s8 }
  0x24   : > { %s1119_s9 = scalar_lea.vmem %s1118_s8, 1024  ;;  %p1120_p9 = scmp.lt.s32.totalorder %s1315_s12, %s1118_s8 }
  0x25   : > { %p1115_p5 = pnand %p1113_p2, %p1099_p3  ;;  %p1121_p4 = scmp.lt.s32.totalorder %s1119_s9, %s1112_s5 }
  0x27   : > { %p1116_p11 = pneg %p1115_p5  ;;  %p1122_p7 = por %p1121_p4, %p1120_p9 }
  0x29   : > { %p1123_p10 = pnand %p1122_p7, %p1116_p11 }
  0x2b   : > { %1126 = shalt.err (!%p1123_p10)
}
  0x2c   : > { %s1212_s11 = smov 128   ;;  %s1213_s21 = smov 8  }
  0x2d   : > { %994 = dma.hbm_to_vmem [thread:$0]  (!%p1319_p0), %s1313_s10, 512, %s1315_s12, %s1324_s14, %s1212_s11, %s1212_s11, %s1213_s21  }
  0x2e   : > { %p219_p12 = scmp.lt.s32.totalorder %s1209_s20, 3  ;;  %p1623_p1 = scmp.ge.s32.totalorder %s1209_s20, 1 }
  0x30   : > { %p220_p3 = pnand %p1623_p1, %p219_p12 }
  0x31   : > { %s1356_s22 = sand.u32 (!%p220_p3), 1, %s1193_s16  }
  0x32   : > { %223 = sbr.rel (%p220_p3) target bundleno = 712 (0x2c8), region = 36  ;;  %s913_s24 = sshll.u32 (!%p220_p3), %s1356_s22, 5 }
  0x33   : > { %s226_s25 = scalar_lea.sflag (!%p220_p3), [#allocation3], %s1356_s22  ;;  %s1360_s26 = scalar_lea.vmem (!%p220_p3), [#allocation2], %s913_s24 }
  0x39   : > { %1180 = dma.done.wait (%p1291_p8), %s226_s25, 512  }
  0x3a   : > { %1182 = vsyncadd (%p1291_p8), %s226_s25, 4294966784  ;;  %p263_p9 = scmp.lt.s32.totalorder %s1201_s18, 1  ;;  %vm302_vm0 = vcmask 1043456   ;;  %vm295_vm1 = vcmask 64512   ;;  %v1055_v2 = vld [vmem:[%s1611_s1] sm:$0xff]   ;;  %v1056_v3 = vld [vmem:[%s1611_s1 + $0x8] sm:$0xff]  }
  0x3b   : > { %954 = vmatprep.mubr.msk.bf16.mxu0 %vm295_vm1, %v1055_v2  ;;  %v275_v4 = vld [vmem:[%s1612_s2] sm:$0xf]  ;;  %s1214_s21 = smov 112   ;;  %s1215_s24 = smov 120   ;;  %v1410_v23 = vld [vmem:[%s1360_s26 + $0x10] sm:$0xff]  ;;  %v1413_v24 = vld [vmem:[%s1360_s26 + $0x8] sm:$0xff] }
  0x3c   : > { %s264_s10 = scalar_select %p263_p9, %s1201_s18, 1  ;;  %983 = vmatprep.subr.msk.bf16.mxu1 %vm302_vm0, %v275_v4  ;;  %v364_v5 = vsel %vm302_vm0, %v275_v4, 0  ;;  %v1406_v22 = vld [vmem:[%s1360_s26] sm:$0xff]  ;;  %v1217_v25 = vmov 0.0   ;;  %vm720_vm3 = vcmp.ne.s32.totalorder %v1410_v23, 4294967295  ;;  %vm719_vm4 = vcmp.ne.s32.totalorder %v1413_v24, 4294967295 }
  0x3d   : > { %959 = vmatpush3.bf16.msra.mxu1 %v364_v5  ;;  %s1216_s25 = smov 104   ;;  %vm718_vm2 = vcmp.ne.s32.totalorder %v1406_v22, 4294967295  ;;  %v1420_v27 = vld [vmem:[%s1360_s26 + $0x18] sm:$0xff]  ;;  %vm742_vm5 = vcmask 261120   ;;  %v930_v28 = vsel %vm720_vm3, 1.0, %v1217_v25  ;;  %v929_v31 = vsel %vm719_vm4, 1.0, %v1217_v25 }
  0x3e   : > { %s915_s12 = sshll.u32 %s264_s10, 2  ;;  %985 = vmatprep.subr.msk.bf16.mxu1 %vm302_vm0, %v275_v4  ;;  %v928_v26 = vsel %vm718_vm2, 1.0, %v1217_v25  ;;  %vm1617_vm6 = vcmp.ne.s32.totalorder %v1420_v27, 4294967295  ;;  %v769_v32 = vsel %vm742_vm5, %v930_v28, 0.0  ;;  %v767_v33 = vsel %vm742_vm5, %v929_v31, 0.0  ;;  %s914_s26 = sshll.u32 %s1356_s22, 1 }
  0x3f   : > { %s266_s6 = scalar_lea.vmem %s1610_s0, %s915_s12  ;;  %v766_v29 = vsel %vm742_vm5, %v928_v26, 0.0  ;;  %v931_v30 = vsel %vm1617_vm6, 1.0, %v1217_v25  ;;  %vm1616_vm7 = vcmask 253952   ;;  %s1434_s10 = scalar_lea.vmem [#allocation5], %s914_s26  ;;  %vm624_vm8 = vcmp.eq.s32.totalorder %v1410_v23, 0 }
  0x40   : > { %v284_v0 = vld [vmem:[%s266_s6] sm:$0xf]  ;;  %v768_v34 = vadd.f32 %v767_v33, %v766_v29  ;;  %v771_v35 = vsel %vm742_vm5, %v931_v30, 0.0  ;;  %vm622_vm9 = vcmp.eq.s32.totalorder %v1406_v22, 0  ;;  %vm625_vm10 = vcmp.eq.s32.totalorder %v1420_v27, 0  ;;  %s933_s12 = sshll.u32 %s1201_s18, 5 }
  0x41   : > { %982 = vmatprep.subr.msk.bf16.mxu0 %vm302_vm0, %v284_v0  ;;  %v304_v1 = vsel %vm302_vm0, %v284_v0, 0  ;;  %vm623_vm11 = vcmp.eq.s32.totalorder %v1413_v24, 0  ;;  %vm652_vm12 = vcmp.eq.s32.totalorder %v1410_v23, 1  ;;  %vm680_vm13 = vcmp.eq.s32.totalorder %v1410_v23, 2  ;;  %s795_s13 = sshll.u32 %s1434_s10, 4  ;;  %s1559_s5 = scalar_lea.hbm %s1614_s4, %s933_s12  ;;  %s1561_s13 = int_to_ptr.vmem [resolvable:$true] %s795_s13 }
  0x42   : > { %953 = vmatpush3.bf16.msra.mxu0 %v304_v1  ;;  %v770_v36 = vadd.f32 %v769_v32, %v768_v34  ;;  %vm650_vm14 = vcmp.eq.s32.totalorder %v1406_v22, 1  ;;  %vm678_vm15 = vcmp.eq.s32.totalorder %v1406_v22, 2  ;;  %vm679_vm6 = vcmp.eq.s32.totalorder %v1413_v24, 2  ;;  %s781_s7 = scalar_lea.sflag [#allocation4], %s1356_s22  ;;  %s1127_s27 = scalar_lea.vmem %s1561_s13, 32 }
  0x43   : > { %984 = vmatprep.subr.msk.bf16.mxu0 %vm302_vm0, %v275_v4  ;;  %p1128_p8 = scmp.ne.s32.totalorder %s1561_s13, %s1127_s27  ;;  %p1626_p11 = scmp.ne.s32.totalorder %s1620_s28, 0 }
  0x44   : > { %v772_v37 = vadd.f32 %v771_v35, %v770_v36  ;;  %s1218_s18 = smov [#allocation5]  }
  0x45   : > { %955 = vmatmul.mubr.msk.bf16.vlgmr.msra.gmra.mrb[0].mxu0 %vm295_vm1, %v1056_v3  ;;  %p1129_p0 = pnand %p1128_p8, %p1626_p11  ;;  %s1131_s8 = sshll.u32 %s1218_s18, 4  ;;  %s1132_s8 = int_to_ptr.vmem [resolvable:$false] %s1131_s8 }
  0x46   : > { %965 = vmatpush3.bf16.msra.mxu0 %v364_v5  ;;  %v773_v38 = vrot.slane %v772_v37, 4  ;;  %s1133_s9 = scalar_lea.vmem %s1132_s8, 64  ;;  %p1134_p13 = scmp.lt.s32.totalorder %s1561_s13, %s1132_s8 }
  0x47   : > { %986 = vmatprep.subr.msk.bf16.mxu0 %vm302_vm0, %v275_v4  ;;  %vm653_vm0 = vcmp.eq.s32.totalorder %v1420_v27, 1  ;;  %p1130_p6 = pneg %p1129_p0  ;;  %p1135_p2 = scmp.lt.s32.totalorder %s1133_s9, %s1127_s27 }
  0x48   : > { %v774_v39 = vadd.f32 %v773_v38, %v772_v37 }
  0x49   : > { %p1136_p5 = por %p1135_p2, %p1134_p13 }
  0x4a   : > { %v775_v40 = vrot.slane %v774_v39, 2 }
  0x4b   : > { %p1137_p4 = pnand %p1136_p5, %p1130_p6 }
  0x4c   : > { %v776_v41 = vadd.f32 %v775_v40, %v774_v39 }
  0x4e   : > { %v777_v42 = vrot.slane %v776_v41, 1 }
  0x50   : > { %v778_v43 = vadd.f32 %v777_v42, %v776_v41 }
  0x52   : > { %779 = vst.msk [vmem:[%s1434_s10 + $0x1] sm:$0x1] %vm1616_vm7, %v778_v43  ;;  %vm651_vm7 = vcmp.eq.s32.totalorder %v1413_v24, 1 }
 0x118   : > { %v956_v6 = vpop.f32.mrb[0].mxu0 }
 0x119   : > { %v340_v7 = vpop.f32.mrb[1].mxu0 }
 0x11a   : > { %v957_v8 = vpop.f32.mrb[2].mxu0 }
 0x11b   : > { %v356_v9 = vpack.c.bf16 %v957_v8, %v956_v6  ;;  %v343_v10 = vpop.f32.mrb[3].mxu0 }
 0x11c   : > { %v355_v11 = vpack.c.bf16 %v343_v10, %v340_v7 }
 0x11d   : > { %482 = vrot.lane.b32.xlu1 %v356_v9, %s1214_s21 }
 0x11e   : > { %417 = vrot.lane.b32.xlu0 %v355_v11, %s1215_s24  ;;  %960 = vmatprep.mubr.msk.bf16.mxu1 %vm295_vm1, %v355_v11 }
 0x11f   : > { %961 = vmatmul.mubr.msk.bf16.vlgmr.msra.gmra.mrb[0].mxu1 %vm295_vm1, %v356_v9 }
 0x120   : > { %971 = vmatpush3.bf16.msra.mxu1 %v364_v5 }
 0x121   : > { %480 = vrot.lane.b32.xlu1 %v355_v11, %s1214_s21 }
 0x122   : > { %419 = vrot.lane.b32.xlu0 %v356_v9, %s1215_s24 }
 0x125   : > { %545 = vrot.lane.b32.xlu1 %v356_v9, %s1216_s25 }
 0x126   : > { %543 = vrot.lane.b32.xlu0 %v355_v11, %s1216_s25 }
 0x18f   : > { %v483_v12 = vpop.permute.xlu1 %482 }
 0x190   : > { %v418_v13 = vpop.permute.xlu0 %417 }
 0x191   : > { %966 = vmatprep.mubr.msk.bf16.mxu0 %vm295_vm1, %v418_v13 }
 0x193   : > { %v481_v14 = vpop.permute.xlu1 %480 }
 0x194   : > { %v420_v15 = vpop.permute.xlu0 %419  ;;  %972 = vmatprep.mubr.msk.bf16.mxu1 %vm295_vm1, %v481_v14 }
 0x195   : > { %967 = vmatmul.mubr.msk.bf16.vlgmr.msra.gmra.mrb[4].mxu0 %vm295_vm1, %v420_v15  ;;  %973 = vmatmul.mubr.msk.bf16.vlgmr.msra.gmra.mrb[4].mxu1 %vm295_vm1, %v483_v12 }
 0x196   : > { %977 = vmatpush3.bf16.msra.mxu0 %v364_v5 }
 0x197   : > { %v546_v17 = vpop.permute.xlu1 %545 }
 0x198   : > { %v544_v16 = vpop.permute.xlu0 %543 }
 0x199   : > { %978 = vmatprep.mubr.msk.bf16.mxu0 %vm295_vm1, %v544_v16 }
 0x19d   : > { %979 = vmatmul.mubr.msk.bf16.vlgmr.msra.gmra.mrb[8].mxu0 %vm295_vm1, %v546_v17  ;;  %vm681_vm1 = vcmp.eq.s32.totalorder %v1420_v27, 2 }
 0x1f2   : > { %v1397_v18 = vpop.f32.mrb[0].mxu1 }
 0x1f3   : > { %v1399_v19 = vpop.f32.mrb[1].mxu1  ;;  %v628_v44 = vsel %vm624_vm8, %v1397_v18, 0.0  ;;  %vm708_vm8 = vcmp.eq.s32.totalorder %v1410_v23, 3 }
 0x1f4   : > { %v1401_v20 = vpop.f32.mrb[2].mxu1  ;;  %v626_v45 = vsel %vm622_vm9, %v1399_v19, 0.0  ;;  %vm706_vm9 = vcmp.eq.s32.totalorder %v1406_v22, 3 }
 0x1f5   : > { %v1403_v21 = vpop.f32.mrb[3].mxu1  ;;  %v629_v46 = vsel %vm625_vm10, %v1401_v20, 0.0  ;;  %vm1624_vm10 = vcmp.ne.s32.totalorder %v1420_v27, 4294967295 }
 0x1f6   : > { %v627_v49 = vsel %vm623_vm11, %v1403_v21, 0.0 }
 0x268   : > { %v968_v47 = vpop.f32.mrb[4].mxu0  ;;  %v974_v48 = vpop.f32.mrb[4].mxu1 }
 0x269   : > { %v478_v50 = vmax.f32 %v1397_v18, %v968_v47  ;;  %v656_v51 = vsel %vm652_vm12, %v968_v47, 0.0  ;;  %v684_v52 = vsel %vm680_vm13, %v974_v48, 0.0  ;;  %v461_v53 = vpop.f32.mrb[5].mxu0  ;;  %v524_v54 = vpop.f32.mrb[5].mxu1 }
 0x26a   : > { %v660_v55 = vadd.f32 %v656_v51, %v628_v44  ;;  %v476_v56 = vmax.f32 %v1399_v19, %v461_v53  ;;  %v654_v57 = vsel %vm650_vm14, %v461_v53, 0.0  ;;  %v682_v58 = vsel %vm678_vm15, %v524_v54, 0.0  ;;  %v1460_v59 = vpop.f32.mrb[6].mxu0  ;;  %v1462_v60 = vpop.f32.mrb[6].mxu1 }
 0x26b   : > { %v541_v61 = vmax.f32 %v478_v50, %v974_v48  ;;  %v658_v62 = vadd.f32 %v654_v57, %v626_v45  ;;  %v479_v63 = vmax.f32 %v1401_v20, %v1460_v59  ;;  %v657_v0 = vsel %vm653_vm0, %v1460_v59, 0.0  ;;  %v1469_v1 = vpop.f32.mrb[7].mxu0  ;;  %v1471_v2 = vpop.f32.mrb[7].mxu1 }
 0x26c   : > { %v688_v3 = vadd.f32 %v684_v52, %v660_v55  ;;  %v539_v4 = vmax.f32 %v476_v56, %v524_v54  ;;  %v661_v5 = vadd.f32 %v657_v0, %v629_v46  ;;  %v685_v6 = vsel %vm681_vm1, %v1462_v60, 0.0 }
 0x26d   : > { %v686_v7 = vadd.f32 %v682_v58, %v658_v62  ;;  %v542_v8 = vmax.f32 %v479_v63, %v1462_v60  ;;  %v477_v9 = vmax.f32 %v1403_v21, %v1469_v1  ;;  %v655_v10 = vsel %vm651_vm7, %v1469_v1, 0.0 }
 0x26e   : > { %v689_v11 = vadd.f32 %v685_v6, %v661_v5  ;;  %v659_v12 = vadd.f32 %v655_v10, %v627_v49  ;;  %v683_v14 = vsel %vm679_vm6, %v1471_v2, 0.0  ;;  %vm709_vm7 = vcmp.eq.s32.totalorder %v1420_v27, 3 }
 0x26f   : > { %v540_v13 = vmax.f32 %v477_v9, %v1471_v2  ;;  %vm707_vm6 = vcmp.eq.s32.totalorder %v1413_v24, 3 }
 0x270   : > { %v687_v15 = vadd.f32 %v683_v14, %v659_v12  ;;  %v980_v16 = vpop.f32.mrb[8].mxu0 }
 0x271   : > { %v1488_v17 = vmax.f32 %v541_v61, %v980_v16  ;;  %v712_v25 = vsel %vm708_vm8, %v980_v16, 0.0  ;;  %v587_v26 = vpop.f32.mrb[9].mxu0 }
 0x272   : > { %v1490_v28 = vadd.f32 %v712_v25, %v688_v3  ;;  %v1492_v29 = vmax.f32 %v539_v4, %v587_v26  ;;  %v710_v30 = vsel %vm706_vm9, %v587_v26, 0.0  ;;  %v981_v31 = vpop.f32.mrb[10].mxu0 }
 0x273   : > { %v608_v32 = vsub.f32 %v1397_v18, %v1488_v17  ;;  %v636_v33 = vsub.f32 %v968_v47, %v1488_v17  ;;  %v664_v34 = vsub.f32 %v974_v48, %v1488_v17  ;;  %v692_v35 = vsub.f32 %v980_v16, %v1488_v17  ;;  %v590_v36 = vpop.f32.mrb[11].mxu0 }
 0x274   : > { %v606_v37 = vsub.f32 %v1399_v19, %v1492_v29  ;;  %v634_v38 = vsub.f32 %v461_v53, %v1492_v29  ;;  %v662_v39 = vsub.f32 %v524_v54, %v1492_v29  ;;  %v690_v40 = vsub.f32 %v587_v26, %v1492_v29 }
 0x275   : > { %v614_v41 = vmul.f32 1.442695, %v608_v32  ;;  %v642_v42 = vmul.f32 1.442695, %v636_v33  ;;  %v670_v43 = vmul.f32 1.442695, %v664_v34  ;;  %v1505_v18 = vadd.f32 %v710_v30, %v686_v7 }
 0x276   : > { %v698_v44 = vmul.f32 1.442695, %v692_v35  ;;  %v610_v45 = vmul.f32 1.442695, %v606_v37  ;;  %v1507_v46 = vmax.f32 %v542_v8, %v981_v31  ;;  %v638_v47 = vmul.f32 1.442695, %v634_v38 }
 0x277   : > { %1057 = vpow2.f32 %v614_v41  ;;  %v666_v19 = vmul.f32 1.442695, %v662_v39  ;;  %v713_v48 = vsel %vm709_vm7, %v981_v31, 0.0  ;;  %v1521_v54 = vmax.f32 %v540_v13, %v590_v36 }
 0x278   : > { %1059 = vpow2.f32 %v642_v42  ;;  %v609_v49 = vsub.f32 %v1401_v20, %v1507_v46  ;;  %v637_v50 = vsub.f32 %v1460_v59, %v1507_v46  ;;  %v665_v51 = vsub.f32 %v1462_v60, %v1507_v46 }
 0x279   : > { %1061 = vpow2.f32 %v670_v43  ;;  %v693_v52 = vsub.f32 %v981_v31, %v1507_v46  ;;  %v1519_v53 = vadd.f32 %v713_v48, %v689_v11  ;;  %v694_v55 = vmul.f32 1.442695, %v690_v40 }
 0x27a   : > { %1063 = vpow2.f32 %v698_v44  ;;  %v616_v56 = vmul.f32 1.442695, %v609_v49  ;;  %v644_v57 = vmul.f32 1.442695, %v637_v50  ;;  %v607_v20 = vsub.f32 %v1403_v21, %v1521_v54 }
 0x27b   : > { %1065 = vpow2.f32 %v610_v45  ;;  %v635_v58 = vsub.f32 %v1469_v1, %v1521_v54  ;;  %v663_v59 = vsub.f32 %v1471_v2, %v1521_v54  ;;  %v691_v60 = vsub.f32 %v590_v36, %v1521_v54 }
 0x27c   : > { %1067 = vpow2.f32 %v638_v47  ;;  %v711_v61 = vsel %vm707_vm6, %v590_v36, 0.0  ;;  %v672_v62 = vmul.f32 1.442695, %v665_v51  ;;  %v700_v0 = vmul.f32 1.442695, %v693_v52 }
 0x27d   : > { %1069 = vpow2.f32 %v666_v19  ;;  %v1532_v63 = vadd.f32 %v711_v61, %v687_v15  ;;  %v612_v21 = vmul.f32 1.442695, %v607_v20  ;;  %v640_v3 = vmul.f32 1.442695, %v635_v58 }
 0x27e   : > { %1071 = vpow2.f32 %v694_v55  ;;  %v668_v2 = vmul.f32 1.442695, %v663_v59  ;;  %v696_v8 = vmul.f32 1.442695, %v691_v60 }
 0x27f   : > { %1073 = vpow2.f32 %v616_v56 }
 0x280   : > { %1075 = vpow2.f32 %v644_v57 }
 0x281   : > { %v1058_v1 = vpop.eup %1057  ;;  %1077 = vpow2.f32 %v672_v62 }
 0x282   : > { %v1060_v4 = vpop.eup %1059  ;;  %1079 = vpow2.f32 %v700_v0 }
 0x283   : > { %v1062_v5 = vpop.eup %1061  ;;  %v648_v6 = vadd.f32 %v1060_v4, %v1058_v1  ;;  %1081 = vpow2.f32 %v612_v21 }
 0x284   : > { %v1064_v7 = vpop.eup %1063  ;;  %1083 = vpow2.f32 %v640_v3 }
 0x285   : > { %v1066_v9 = vpop.eup %1065  ;;  %v676_v10 = vadd.f32 %v1062_v5, %v648_v6  ;;  %1085 = vpow2.f32 %v668_v2 }
 0x286   : > { %v1068_v11 = vpop.eup %1067  ;;  %1087 = vpow2.f32 %v696_v8 }
 0x287   : > { %v1070_v12 = vpop.eup %1069  ;;  %v704_v13 = vadd.f32 %v1064_v7, %v676_v10  ;;  %v646_v14 = vadd.f32 %v1068_v11, %v1066_v9 }
 0x288   : > { %v1072_v15 = vpop.eup %1071 }
 0x289   : > { %v1074_v16 = vpop.eup %1073  ;;  %1089 = vlog2.f32 %v704_v13  ;;  %v674_v25 = vadd.f32 %v1070_v12, %v646_v14 }
 0x28a   : > { %v1076_v26 = vpop.eup %1075 }
 0x28b   : > { %v1078_v30 = vpop.eup %1077  ;;  %v702_v31 = vadd.f32 %v1072_v15, %v674_v25  ;;  %v649_v32 = vadd.f32 %v1076_v26, %v1074_v16 }
 0x28c   : > { %v1080_v33 = vpop.eup %1079 }
 0x28d   : > { %v1082_v34 = vpop.eup %1081  ;;  %1091 = vlog2.f32 %v702_v31  ;;  %v677_v35 = vadd.f32 %v1078_v30, %v649_v32 }
 0x28e   : > { %v1084_v36 = vpop.eup %1083 }
 0x28f   : > { %v705_v37 = vadd.f32 %v1080_v33, %v677_v35  ;;  %v647_v38 = vadd.f32 %v1084_v36, %v1082_v34  ;;  %v1086_v39 = vpop.eup %1085 }
 0x290   : > { %v1088_v41 = vpop.eup %1087 }
 0x291   : > { %1093 = vlog2.f32 %v705_v37  ;;  %v675_v40 = vadd.f32 %v1086_v39, %v647_v38 }
 0x293   : > { %v1090_v42 = vpop.eup %1089  ;;  %v703_v43 = vadd.f32 %v1088_v41, %v675_v40 }
 0x294   : > { %v727_v44 = vmul.f32 0.6931472, %v1090_v42 }
 0x295   : > { %1095 = vlog2.f32 %v703_v43 }
 0x296   : > { %v732_v45 = vadd.f32 %v727_v44, %v1488_v17 }
 0x297   : > { %v1092_v47 = vpop.eup %1091 }
 0x298   : > { %v736_v19 = vsub.f32 %v732_v45, %v1490_v28  ;;  %v723_v48 = vmul.f32 0.6931472, %v1092_v47 }
 0x29a   : > { %v730_v49 = vadd.f32 %v723_v48, %v1492_v29  ;;  %v740_v29 = vsel %vm720_vm3, %v736_v19, 0.0 }
 0x29b   : > { %v1094_v50 = vpop.eup %1093  ;;  %v746_v59 = vsel %vm742_vm5, %v740_v29, 0.0 }
 0x29c   : > { %v734_v51 = vsub.f32 %v730_v49, %v1505_v18  ;;  %v729_v52 = vmul.f32 0.6931472, %v1094_v50 }
 0x29e   : > { %v733_v55 = vadd.f32 %v729_v52, %v1507_v46  ;;  %v738_v17 = vsel %vm718_vm2, %v734_v51, 0.0  ;;  %vm1625_vm2 = vcmask 253952  }
 0x29f   : > { %v1096_v56 = vpop.eup %1095  ;;  %v743_v46 = vsel %vm742_vm5, %v738_v17, 0.0 }
 0x2a0   : > { %v737_v57 = vsub.f32 %v733_v55, %v1519_v53  ;;  %v725_v20 = vmul.f32 0.6931472, %v1096_v56 }
 0x2a2   : > { %v731_v58 = vadd.f32 %v725_v20, %v1521_v54  ;;  %v741_v54 = vsel %vm1624_vm10, %v737_v57, 0.0 }
 0x2a3   : > { %v748_v23 = vsel %vm742_vm5, %v741_v54, 0.0 }
 0x2a4   : > { %v735_v28 = vsub.f32 %v731_v58, %v1532_v63 }
 0x2a6   : > { %v739_v18 = vsel %vm719_vm4, %v735_v28, 0.0 }
 0x2a7   : > { %v744_v53 = vsel %vm742_vm5, %v739_v18, 0.0 }
 0x2a8   : > { %v745_v22 = vadd.f32 %v744_v53, %v743_v46 }
 0x2aa   : > { %v747_v60 = vadd.f32 %v746_v59, %v745_v22 }
 0x2ac   : > { %v749_v61 = vadd.f32 %v748_v23, %v747_v60 }
 0x2ae   : > { %v750_v62 = vrot.slane %v749_v61, 4 }
 0x2b0   : > { %v751_v24 = vadd.f32 %v750_v62, %v749_v61 }
 0x2b2   : > { %v752_v63 = vrot.slane %v751_v24, 2 }
 0x2b4   : > { %v753_v0 = vadd.f32 %v752_v63, %v751_v24 }
 0x2b6   : > { %v754_v21 = vrot.slane %v753_v0, 1 }
 0x2b8   : > { %v755_v3 = vadd.f32 %v754_v21, %v753_v0 }
 0x2ba   : > { %757 = vst.msk [vmem:[%s1434_s10] sm:$0x1] %vm1625_vm2, %v755_v3 }
 0x2bb   : > { %1140 = shalt.err (!%p1137_p4)
}
 0x2bc   : > { %s1141_s22 = scalar_lea.hbm %s1559_s5, 32  ;;  %s1145_s24 = scalar_lea.hbm %s1614_s4, 64 }
 0x2bd   : > { %p1142_p7 = scmp.ne.s32.totalorder %s1559_s5, %s1141_s22  ;;  %p1146_p1 = scmp.lt.u32.totalorder %s1559_s5, %s1614_s4 }
 0x2be   : > { %p1147_p3 = scmp.lt.u32.totalorder %s1145_s24, %s1141_s22  ;;  %p1149_p8 = scmp.lt.u32.totalorder %s1141_s22, %s1559_s5 }
 0x2bf   : > { %p1143_p10 = pnand %p1142_p7, %p1626_p11 }
 0x2c0   : > { %p1148_p9 = por %p1147_p3, %p1146_p1 }
 0x2c1   : > { %p1144_p12 = pneg %p1143_p10 }
 0x2c2   : > { %p1150_p0 = por %p1149_p8, %p1148_p9 }
 0x2c4   : > { %p1151_p6 = pnand %p1150_p0, %p1144_p12 }
 0x2c6   : > { %1154 = shalt.err (!%p1151_p6)
}
 0x2c7   : > { %989 = dma.vmem_to_hbm [thread:$0]  (%p1626_p11), %s1561_s13, 32, %s1559_s5, %s781_s7  }
 0x2c8 PF: > { %s807_s10 = sand.u32 1, %s1189_s15   ;;  %p1627_p13 = scmp.ne.s32.totalorder %s1621_s30, 0 }
 0x2c9   : > { %p1628_p2 = scmp.ge.s32.totalorder %s1209_s20, 2  ;;  %s808_s12 = scalar_lea.sflag [#allocation4], %s807_s10 }
 0x2cb   : > { %p996_p5 = pnand %p1628_p2, %p1627_p13 }
 0x2cd   : > { %1184 = dma.done.wait (!%p996_p5), %s808_s12, 32  }
 0x2ce   : > { %1186 = vsyncadd (!%p996_p5), %s808_s12, 4294967264  ;;  %s20_s20 = sadd.s32 1, %s1209_s20   ;;  %s1629_s15 = smov %s1193_s16 }
 0x2cf   : > { %p17_p4 = scmp.ge.s32.totalorder %s20_s20, 4   ;;  %s1630_s16 = smov %s1197_s17 }
 0x2d0   : > { %s1631_s17 = smov %s1300_s29  ;;  %s1632_s18 = smov %s1205_s19 }
 0x2d1   : > { %s1633_s19 = smov %s1635_s23  ;;  %19 = sbr.rel (!%p17_p4) target bundleno = 6 (0x6), region = 87 }
 0x2d8   :  { %813 = vsyncpa [#allocation3], 1 }
 0x2d9   :  { %815 = vsyncpa [#allocation3 + $0x1], 1 }
 0x2da   :  { %816 = vsyncpa [#allocation4], 1 }
 0x2db   :  { %818 = vsyncpa [#allocation4 + $0x1], 1 }

</bundles_post_ra>
